<compile_context>
chip_gen: v6e
topology: v6e:2x2x1
jax: 0.10.0
libtpu: 0.0.40
codegen_flags: <defaults>
</compile_context>

<pallas_src>
import functools

import jax
import jax.numpy as jnp
from jax.experimental import pallas as pl
from jax.experimental.pallas import tpu as pltpu

_NEG_FILL = -1e9  # padded logits -> sigmoid == 0 -> exactly zero contribution


def _round_up(x, m):
    return (x + m - 1) // m * m


def _static_pow(base, g):
    """base ** g for a static Python exponent.

    Integer exponents are expanded into VPU multiplies (exponentiation by
    squaring) so no EUP pow (= exp*log) is emitted.  Non-integer falls back to
    jnp.power.
    """
    gf = float(g)
    if gf == 0.0:
        return jnp.ones_like(base)
    if gf == int(gf) and 1 <= int(gf) <= 16:
        gi = int(gf)
        result = None
        acc = base
        while gi:
            if gi & 1:
                result = acc if result is None else result * acc
            gi >>= 1
            if gi:
                acc = acc * acc
        return result
    # TODO(synk): non-integer gamma falls back to EUP pow.
    return jnp.power(base, gf)


def _asl_kernel(x_ref, ypos_ref, out_ref, *, gamma_neg, gamma_pos, clip, eps, fold):
    x = x_ref[...].astype(jnp.float32)                      # (TILE_R, W)
    lane = jax.lax.broadcasted_iota(jnp.int32, x.shape, 1)  # lane ids

    # one-hot targets: lane == any of the `fold` target lane positions of this
    # (folded) row.  `fold` is a small static int -> fully unrolled VPU compares.
    targets = lane == ypos_ref[:, 0:1]
    for j in range(1, fold):
        targets = jnp.logical_or(targets, lane == ypos_ref[:, j:j + 1])

    xs_pos = jax.nn.sigmoid(x)
    xs_neg = 1.0 - xs_pos
    if clip is not None and clip > 0:
        xs_neg = jnp.minimum(xs_neg + clip, 1.0)

    # p = probability assigned to the true binary label of each element.
    # One log instead of two; the focal weight is pure VPU (select + muls).
    p = jnp.where(targets, xs_pos, xs_neg)
    loss = jnp.log(jnp.maximum(p, eps))

    if gamma_neg > 0 or gamma_pos > 0:
        base = 1.0 - p                                      # matches torch: 1 - xs_pos*t - xs_neg*(1-t)
        w = jnp.where(targets,
                      _static_pow(base, gamma_pos),
                      _static_pow(base, gamma_neg))
        loss = loss * w

    partial = -jnp.sum(loss)                                # XLU cross-lane reduce
    out_ref[...] = jnp.full(out_ref.shape, partial, dtype=out_ref.dtype)


def asymmetric_loss(x, y, *, nclass, gamma_neg=4, gamma_pos=1, clip=0.05,
                    eps=1e-8):
    """x: (N, nclass) float logits (f32 or bf16); y: (N,) int labels. -> scalar."""
    N, C = x.shape
    assert C == nclass
    y = y.astype(jnp.int32)

    # ---- lane-dense folding: pack F rows of C classes into one 128-lane row.
    if C < 128 and 128 % C == 0 and 2 <= 128 // C <= 16:
        fold = 128 // C
    else:
        fold = 1
    W = fold * C

    x2 = x
    n_pad = (-N) % fold
    if n_pad:
        x2 = jnp.pad(x2, ((0, n_pad), (0, 0)), constant_values=_NEG_FILL)
    n_total = N + n_pad
    if fold > 1:
        x2 = x2.reshape(n_total // fold, W)

    # target lane position of each original row inside its folded row
    ypos = (jnp.arange(N, dtype=jnp.int32) % fold) * C + y
    if n_pad:
        ypos = jnp.pad(ypos, (0, n_pad), constant_values=-1)
    ypos = ypos.reshape(n_total // fold, fold)

    rows = n_total // fold

    # ---- tile over rows; keep each (double-buffered) x tile <= ~4 MiB.
    # TODO(synk): for extremely large C a 2-D (row, class) grid would tile the
    # class axis too; here we only shrink the row tile.
    tile_r = 512
    itemsize = jnp.dtype(x2.dtype).itemsize
    while tile_r > 8 and tile_r * W * itemsize > (4 << 20):
        tile_r //= 2
    tile_r = min(tile_r, _round_up(rows, 8))
    r_pad = (-rows) % tile_r
    if r_pad:
        x2 = jnp.pad(x2, ((0, r_pad), (0, 0)), constant_values=_NEG_FILL)
        ypos = jnp.pad(ypos, ((0, r_pad), (0, 0)), constant_values=-1)
    num_tiles = (rows + r_pad) // tile_r

    kernel = functools.partial(
        _asl_kernel,
        gamma_neg=float(gamma_neg),
        gamma_pos=float(gamma_pos),
        clip=clip,
        eps=float(eps),
        fold=fold,
    )

    partials = pl.pallas_call(
        kernel,
        grid=(num_tiles,),
        in_specs=[
            pl.BlockSpec((tile_r, W), lambda i: (i, 0)),       # logits tile
            pl.BlockSpec((tile_r, fold), lambda i: (i, 0)),    # target lane ids
        ],
        out_specs=pl.BlockSpec((1, 8, 128), lambda i: (i, 0, 0)),
        out_shape=jax.ShapeDtypeStruct((num_tiles, 8, 128), jnp.float32),
        compiler_params=pltpu.CompilerParams(
            dimension_semantics=("parallel",),     # distinct out block per tile
            vmem_limit_bytes=32 * 1024 * 1024,
        ),
    )(x2, ypos)

    # tiny final reduce over per-tile partial sums
    return jnp.sum(partials[:, 0, 0])


def _reference(x, y, nclass, gamma_neg=4, gamma_pos=1, clip=0.05, eps=1e-8):
    targets = jax.nn.one_hot(y, nclass, dtype=jnp.float32)
    anti = 1.0 - targets
    xs_pos = jax.nn.sigmoid(x.astype(jnp.float32))
    xs_neg = 1.0 - xs_pos
    if clip is not None and clip > 0:
        xs_neg = jnp.minimum(xs_neg + clip, 1.0)
    loss = targets * jnp.log(jnp.maximum(xs_pos, eps))
    loss = loss + anti * jnp.log(jnp.maximum(xs_neg, eps))
    if gamma_neg > 0 or gamma_pos > 0:
        w = jnp.power(1.0 - xs_pos * targets - xs_neg * anti,
                      gamma_pos * targets + gamma_neg * anti)
        loss = loss * w
    return -loss.sum()


if __name__ == "__main__":
    key = jax.random.PRNGKey(0)

    # (batch, nclass, dtype): folded path, non-divisible batch, no-fold path
    configs = [
        (8, 16, jnp.float32),
        (11, 16, jnp.float32),
        (12, 128, jnp.float32),
    ]
    for batch, nclass, dt in configs:
        key, kx, ky = jax.random.split(key, 3)
        x = jax.random.normal(kx, (batch, nclass), dtype=dt)
        y = jax.random.randint(ky, (batch,), 0, nclass, dtype=jnp.int32)

        out = asymmetric_loss(x, y, nclass=nclass)
        out = jax.block_until_ready(out)

        ref = _reference(x, y, nclass)
        assert jnp.allclose(out, ref, rtol=1e-5, atol=1e-4), (batch, nclass, out, ref)

    print("KERNEL_OK")
</pallas_src>

<mosaic_0001>
module attributes {stable_mosaic.version = 11 : i64} {
  func.func @_asl_kernel(%arg0: i32, %arg1: memref<8x128xf32, #tpu.memory_space<vmem>>, %arg2: memref<8x8xi32, #tpu.memory_space<vmem>>, %arg3: memref<1x8x128xf32, #tpu.memory_space<vmem>>) attributes {dimension_semantics = [#tpu.dimension_semantics<parallel>], iteration_bounds = array<i64: 1>, scalar_prefetch = 0 : i64, scratch_operands = 0 : i64, tpu.core_type = #tpu.core_type<tc>, window_params = [{transform_indices = @transform_0, window_bounds = array<i64: 8, 128>}, {transform_indices = @transform_1, window_bounds = array<i64: 8, 8>}, {transform_indices = @transform_2, window_bounds = array<i64: 1, 8, 128>}]} {
    %c0 = arith.constant 0 : index
    %c0_0 = arith.constant 0 : index
    %0 = vector.load %arg1[%c0, %c0_0] : memref<8x128xf32, #tpu.memory_space<vmem>>, vector<8x128xf32>
    %1 = tpu.iota {dimensions = array<i32: 1>} : vector<8x128xi32>
    %c0_1 = arith.constant 0 : index
    %c0_2 = arith.constant 0 : index
    %2 = vector.load %arg2[%c0_1, %c0_2] : memref<8x8xi32, #tpu.memory_space<vmem>>, vector<8x1xi32>
    %3 = vector.broadcast %2 : vector<8x1xi32> to vector<8x128xi32>
    %4 = arith.cmpi eq, %1, %3 : vector<8x128xi32>
    %c0_3 = arith.constant 0 : index
    %c1 = arith.constant 1 : index
    %5 = vector.load %arg2[%c0_3, %c1] : memref<8x8xi32, #tpu.memory_space<vmem>>, vector<8x1xi32>
    %6 = vector.broadcast %5 : vector<8x1xi32> to vector<8x128xi32>
    %7 = arith.cmpi eq, %1, %6 : vector<8x128xi32>
    %8 = arith.ori %4, %7 : vector<8x128xi1>
    %c0_4 = arith.constant 0 : index
    %c2 = arith.constant 2 : index
    %9 = vector.load %arg2[%c0_4, %c2] : memref<8x8xi32, #tpu.memory_space<vmem>>, vector<8x1xi32>
    %10 = vector.broadcast %9 : vector<8x1xi32> to vector<8x128xi32>
    %11 = arith.cmpi eq, %1, %10 : vector<8x128xi32>
    %12 = arith.ori %8, %11 : vector<8x128xi1>
    %c0_5 = arith.constant 0 : index
    %c3 = arith.constant 3 : index
    %13 = vector.load %arg2[%c0_5, %c3] : memref<8x8xi32, #tpu.memory_space<vmem>>, vector<8x1xi32>
    %14 = vector.broadcast %13 : vector<8x1xi32> to vector<8x128xi32>
    %15 = arith.cmpi eq, %1, %14 : vector<8x128xi32>
    %16 = arith.ori %12, %15 : vector<8x128xi1>
    %c0_6 = arith.constant 0 : index
    %c4 = arith.constant 4 : index
    %17 = vector.load %arg2[%c0_6, %c4] : memref<8x8xi32, #tpu.memory_space<vmem>>, vector<8x1xi32>
    %18 = vector.broadcast %17 : vector<8x1xi32> to vector<8x128xi32>
    %19 = arith.cmpi eq, %1, %18 : vector<8x128xi32>
    %20 = arith.ori %16, %19 : vector<8x128xi1>
    %c0_7 = arith.constant 0 : index
    %c5 = arith.constant 5 : index
    %21 = vector.load %arg2[%c0_7, %c5] : memref<8x8xi32, #tpu.memory_space<vmem>>, vector<8x1xi32>
    %22 = vector.broadcast %21 : vector<8x1xi32> to vector<8x128xi32>
    %23 = arith.cmpi eq, %1, %22 : vector<8x128xi32>
    %24 = arith.ori %20, %23 : vector<8x128xi1>
    %c0_8 = arith.constant 0 : index
    %c6 = arith.constant 6 : index
    %25 = vector.load %arg2[%c0_8, %c6] : memref<8x8xi32, #tpu.memory_space<vmem>>, vector<8x1xi32>
    %26 = vector.broadcast %25 : vector<8x1xi32> to vector<8x128xi32>
    %27 = arith.cmpi eq, %1, %26 : vector<8x128xi32>
    %28 = arith.ori %24, %27 : vector<8x128xi1>
    %c0_9 = arith.constant 0 : index
    %c7 = arith.constant 7 : index
    %29 = vector.load %arg2[%c0_9, %c7] : memref<8x8xi32, #tpu.memory_space<vmem>>, vector<8x1xi32>
    %30 = vector.broadcast %29 : vector<8x1xi32> to vector<8x128xi32>
    %31 = arith.cmpi eq, %1, %30 : vector<8x128xi32>
    %32 = arith.ori %28, %31 : vector<8x128xi1>
    %33 = arith.negf %0 : vector<8x128xf32>
    %34 = math.exp %33 : vector<8x128xf32>
    %cst = arith.constant 1.000000e+00 : f32
    %35 = vector.broadcast %cst : f32 to vector<8x128xf32>
    %36 = arith.addf %35, %34 : vector<8x128xf32>
    %37 = arith.divf %35, %36 : vector<8x128xf32>
    %cst_10 = arith.constant 1.000000e+00 : f32
    %38 = vector.broadcast %cst_10 : f32 to vector<8x128xf32>
    %39 = arith.subf %38, %37 : vector<8x128xf32>
    %cst_11 = arith.constant 5.000000e-02 : f32
    %40 = vector.broadcast %cst_11 : f32 to vector<8x128xf32>
    %41 = arith.addf %39, %40 : vector<8x128xf32>
    %cst_12 = arith.constant 1.000000e+00 : f32
    %42 = vector.broadcast %cst_12 : f32 to vector<8x128xf32>
    %43 = arith.minimumf %41, %42 : vector<8x128xf32>
    %44 = arith.select %32, %37, %43 : vector<8x128xi1>, vector<8x128xf32>
    %cst_13 = arith.constant 9.99999993E-9 : f32
    %45 = vector.broadcast %cst_13 : f32 to vector<8x128xf32>
    %46 = arith.maximumf %44, %45 : vector<8x128xf32>
    %47 = math.log %46 : vector<8x128xf32>
    %cst_14 = arith.constant 1.000000e+00 : f32
    %48 = vector.broadcast %cst_14 : f32 to vector<8x128xf32>
    %49 = arith.subf %48, %44 : vector<8x128xf32>
    %50 = arith.mulf %49, %49 : vector<8x128xf32>
    %51 = arith.mulf %50, %50 : vector<8x128xf32>
    %52 = arith.select %32, %49, %51 : vector<8x128xi1>, vector<8x128xf32>
    %53 = arith.mulf %47, %52 : vector<8x128xf32>
    %54 = vector.shape_cast %53 : vector<8x128xf32> to vector<1x8x128xf32>
    %cst_15 = arith.constant dense<0.000000e+00> : vector<1xf32>
    %55 = vector.multi_reduction <add>, %54, %cst_15 [1, 2] : vector<1x8x128xf32> to vector<1xf32>
    %56 = vector.shape_cast %55 : vector<1xf32> to vector<1x1x1xf32>
    %57 = vector.extract %56[0, 0, 0] : f32 from vector<1x1x1xf32>
    %cst_16 = arith.constant 0.000000e+00 : f32
    %58 = arith.subf %cst_16, %57 : f32
    %59 = vector.broadcast %58 : f32 to vector<1x8x128xf32>
    %c0_17 = arith.constant 0 : index
    %c0_18 = arith.constant 0 : index
    %c0_19 = arith.constant 0 : index
    %60 = vector.load %arg3[%c0_17, %c0_18, %c0_19] : memref<1x8x128xf32, #tpu.memory_space<vmem>>, vector<1x8x128xf32>
    tpu.vector_store %arg3[%c0_17, %c0_18, %c0_19], %59 {strides = array<i32>} : memref<1x8x128xf32, #tpu.memory_space<vmem>>, vector<1x8x128xf32>,
    return
  }
  func.func @transform_0(%arg0: i32) -> (i32, i32) {
    %c0_i32 = arith.constant 0 : i32
    %c0_i32_0 = arith.constant 0 : i32
    return %arg0, %c0_i32 : i32, i32
  }
  func.func @transform_1(%arg0: i32) -> (i32, i32) {
    %c0_i32 = arith.constant 0 : i32
    %c0_i32_0 = arith.constant 0 : i32
    return %arg0, %c0_i32 : i32, i32
  }
  func.func @transform_2(%arg0: i32) -> (i32, i32, i32) {
    %c0_i32 = arith.constant 0 : i32
    %c0_i32_0 = arith.constant 0 : i32
    %c0_i32_1 = arith.constant 0 : i32
    return %arg0, %c0_i32, %c0_i32_0 : i32, i32, i32
  }
}

</mosaic_0001>

<bundles_post_ra>
// kernel: tpu_custom_call.1
= control target key start
LH: loop header
LB: loop body
LE: loop exit
PB: predicated region body
PF: predicated region fallthrough
CT: control target
= control target key end

     0   :  { %7 = vsyncpa [#allocation3], 0  ;;  %s255_s0 = inlined_call_operand.hbm [shape: f32[8,128], index: 0, kind: input, shape index: {}]   ;;  %s256_s1 = inlined_call_operand.hbm [shape: s32[8,8], index: 1, kind: input, shape index: {}]   ;;  %s257_s2 = inlined_call_operand.hbm [shape: f32[1,8,128], index: 2, kind: output, shape index: {}]  }
   0x1   :  { %8 = vsyncpa [#allocation6], 0 }
   0x2   :  { %9 = vsyncpa [#allocation4], 0  ;;  %s220_s9 = smov [#allocation2]   ;;  %s221_s11 = smov [#allocation5]  }
   0x3   :  { %s16_s10 = sshll.u32 %s220_s9, 4  ;;  %s26_s12 = sshll.u32 %s221_s11, 4  ;;  %s17_s10 = int_to_ptr.vmem [resolvable:$true] %s16_s10  ;;  %s27_s12 = int_to_ptr.vmem [resolvable:$true] %s26_s12 }
   0x4   :  { %s162_s13 = scalar_lea.vmem %s17_s10, 128  ;;  %p167_p1 = scmp.lt.s32.totalorder %s17_s10, %s17_s10 }
   0x5   :  { %p163_p0 = scmp.ne.s32.totalorder %s17_s10, %s162_s13  ;;  %p168_p2 = scmp.lt.s32.totalorder %s162_s13, %s162_s13 }
   0x7   :  { %p169_p3 = por %p168_p2, %p167_p1 }
   0x9   :  { %p170_p4 = pnand %p169_p3, %p163_p0 }
   0xb   :  { %173 = shalt.err (!%p170_p4)
}
   0xc   :  { %19 = dma.hbm_to_vmem [thread:$0]  %s255_s0, 128, %s17_s10, [#allocation3]  }
   0xd   :  { %s182_s16 = scalar_lea.vmem %s27_s12, 128  ;;  %p187_p6 = scmp.lt.s32.totalorder %s27_s12, %s27_s12 }
   0xe   :  { %p183_p5 = scmp.ne.s32.totalorder %s27_s12, %s182_s16  ;;  %p188_p7 = scmp.lt.s32.totalorder %s182_s16, %s182_s16 }
  0x10   :  { %p189_p8 = por %p188_p7, %p187_p6 }
  0x12   :  { %p190_p9 = pnand %p189_p8, %p183_p5 }
  0x14   :  { %193 = shalt.err (!%p190_p9)
}
  0x15   :  { %29 = dma.hbm_to_vmem [thread:$0]  %s256_s1, 128, %s27_s12, [#allocation6]  }
  0x16   :  { %214 = dma.done.wait [#allocation3], 128  }
  0x17   :  { %215 = vsyncadd [#allocation3], 4294967168 }
  0x18   :  { %216 = dma.done.wait [#allocation6], 128  }
  0x19   :  { %217 = vsyncadd [#allocation6], 4294967168  ;;  %v222_v0 = vmov 2   ;;  %v223_v1 = vmov 0   ;;  %v39_v2 = vld [vmem:[#allocation5] sm:$0xff]  ;;  %v224_v3 = vmov 3   ;;  %v37_v15 = vlaneseq }
  0x1a   :  { %141 = vset.pattern.permute.xlu1 %v222_v0  ;;  %139 = vset.pattern.permute.xlu0 %v223_v1  ;;  %v225_v4 = vmov 1   ;;  %v226_v5 = vmov 4   ;;  %v227_v6 = vmov 5   ;;  %v228_v7 = vmov 6   ;;  %v36_v9 = vld [vmem:[#allocation2] sm:$0xff]  ;;  %s230_s0 = smov [#allocation7]  }
  0x1b   :  { %50 = vperm.xlu1 %141, %v39_v2   ;;  %41 = vperm.xlu0 %139, %v39_v2   ;;  %v229_v8 = vmov 7   ;;  %v125_v10 = vmul.f32 -1.442695, %v36_v9  ;;  %v38_v16 = vand.u32 127, %v37_v15  ;;  %s115_s1 = sshll.u32 %s230_s0, 4  ;;  %s116_s1 = int_to_ptr.vmem [resolvable:$true] %s115_s1 }
  0x1c   :  { %s194_s21 = scalar_lea.vmem %s116_s1, 128  ;;  %p199_p11 = scmp.lt.s32.totalorder %s116_s1, %s116_s1 }
  0x1d   :  { %148 = vpow2.f32 %v125_v10  ;;  %p195_p10 = scmp.ne.s32.totalorder %s116_s1, %s194_s21  ;;  %p200_p12 = scmp.lt.s32.totalorder %s194_s21, %s194_s21 }
  0x1f   :  { %142 = vset.pattern.permute.xlu1 %v224_v3  ;;  %140 = vset.pattern.permute.xlu0 %v225_v4  ;;  %p201_p13 = por %p200_p12, %p199_p11 }
  0x20   :  { %55 = vperm.xlu1 %142, %v39_v2   ;;  %45 = vperm.xlu0 %140, %v39_v2  }
  0x21   :  { %p202_p0 = pnand %p201_p13, %p195_p10 }
  0x24   :  { %143 = vset.pattern.permute.xlu1 %v226_v5  ;;  %144 = vset.pattern.permute.xlu0 %v227_v6 }
  0x25   :  { %60 = vperm.xlu1 %143, %v39_v2   ;;  %65 = vperm.xlu0 %144, %v39_v2  }
  0x29   :  { %145 = vset.pattern.permute.xlu1 %v228_v7  ;;  %147 = vset.pattern.permute.xlu0 %v229_v8 }
  0x2a   :  { %70 = vperm.xlu1 %145, %v39_v2   ;;  %v149_v11 = vpop.eup %148 }
  0x2b   :  { %v82_v12 = vadd.f32 1.0, %v149_v11 }
  0x2d   :  { %150 = vrcp.f32 %v82_v12 }
  0x2e   :  { %146 = vset.pattern.permute.xlu1 %v229_v8 }
  0x2f   :  { %75 = vperm.xlu1 %146, %v39_v2  }
  0x3a   :  { %v151_v19 = vpop.eup %150 }
  0x3b   :  { %v85_v21 = vsub.f32 1.0, %v151_v19 }
  0x3d   :  { %v86_v24 = vadd.f32 0.05, %v85_v21 }
  0x3f   :  { %v87_v25 = vmin.f32 %v86_v24, 1.0 }
  0x96   :  { %v51_v13 = vpop.permute.xlu1 %50  ;;  %v42_v14 = vpop.permute.xlu0 %41 }
  0x97   :  { %vm43_vm0 = vcmp.eq.s32.totalorder %v38_v16, %v42_v14  ;;  %vm52_vm3 = vcmp.eq.s32.totalorder %v38_v16, %v51_v13 }
  0x9b   :  { %v56_v17 = vpop.permute.xlu1 %55  ;;  %v46_v18 = vpop.permute.xlu0 %45 }
  0x9c   :  { %vm47_vm1 = vcmp.eq.s32.totalorder %v38_v16, %v46_v18  ;;  %vm57_vm6 = vcmp.eq.s32.totalorder %v38_v16, %v56_v17 }
  0x9d   :  { %vm48_vm2 = vmor %vm43_vm0, %vm47_vm1 }
  0x9e   :  { %vm53_vm4 = vmor %vm48_vm2, %vm52_vm3 }
  0x9f   :  { %vm58_vm7 = vmor %vm53_vm4, %vm57_vm6 }
  0xa0   :  { %v61_v20 = vpop.permute.xlu1 %60  ;;  %v66_v22 = vpop.permute.xlu0 %65 }
  0xa1   :  { %vm62_vm5 = vcmp.eq.s32.totalorder %v38_v16, %v61_v20  ;;  %vm67_vm9 = vcmp.eq.s32.totalorder %v38_v16, %v66_v22 }
  0xa2   :  { %vm63_vm8 = vmor %vm58_vm7, %vm62_vm5 }
  0xa3   :  { %vm68_vm11 = vmor %vm63_vm8, %vm67_vm9 }
  0xa5   :  { %v71_v23 = vpop.permute.xlu1 %70 }
  0xa6   :  { %vm72_vm10 = vcmp.eq.s32.totalorder %v38_v16, %v71_v23 }
  0xa7   :  { %vm73_vm12 = vmor %vm68_vm11, %vm72_vm10 }
  0xaa   :  { %v76_v26 = vpop.permute.xlu1 %75 }
  0xab   :  { %vm77_vm13 = vcmp.eq.s32.totalorder %v38_v16, %v76_v26 }
  0xac   :  { %vm78_vm14 = vmor %vm73_vm12, %vm77_vm13 }
  0xad   :  { %v88_v27 = vsel %vm78_vm14, %v151_v19, %v87_v25 }
  0xae   :  { %v89_v28 = vmax.f32 %v88_v27, 1e-08  ;;  %v92_v29 = vsub.f32 1.0, %v88_v27 }
  0xb0   :  { %152 = vlog2.f32 %v89_v28  ;;  %v93_v30 = vmul.f32 %v92_v29, %v92_v29 }
  0xb2   :  { %v94_v31 = vmul.f32 %v93_v30, %v93_v30 }
  0xb4   :  { %v95_v34 = vsel %vm78_vm14, %v92_v29, %v94_v31 }
  0xbd   :  { %v153_v32 = vpop.eup %152 }
  0xbe   :  { %v91_v33 = vmul.f32 0.6931472, %v153_v32 }
  0xc0   :  { %v96_v35 = vmul.f32 %v95_v34, %v91_v33 }
  0xc2   :  { %97 = vadd.xlane.f32.xlu0 %v96_v35 }
 0x14b   :  { %v98_v36 = vpop.xlane.xlu0 %97 }
 0x14c   :  { %v99_v37 = vrot.slane %v98_v36, 4 }
 0x14e   :  { %v100_v38 = vadd.f32 %v99_v37, %v98_v36 }
 0x150   :  { %v101_v39 = vrot.slane %v100_v38, 2 }
 0x152   :  { %v102_v40 = vadd.f32 %v101_v39, %v100_v38 }
 0x154   :  { %v103_v41 = vrot.slane %v102_v40, 1 }
 0x156   :  { %v104_v42 = vadd.f32 %v103_v41, %v102_v40 }
 0x158   :  { %126 = vpush %v104_v42 }
 0x189   :  { %s127_s19 = spop %126 }
 0x18a   :  { %s106_s20 = ssub.f32 0.0, %s127_s19 }
 0x18c   :  { %v107_v43 = vstv %s106_s20 }
 0x18d   :  { %108 = vst [vmem:[#allocation7] sm:$0xff] %v107_v43 }
 0x18e   :  { %205 = shalt.err (!%p202_p0)
}
 0x18f   :  { %118 = dma.vmem_to_hbm [thread:$0]  %s116_s1, 128, %s257_s2, [#allocation4]  }
 0x190   :  { %218 = dma.done.wait [#allocation4], 128  }
 0x191   :  { %219 = vsyncadd [#allocation4], 4294967168 }
 0x192   :  { %122 = vsyncpa [#allocation3], 1 }
 0x193   :  { %123 = vsyncpa [#allocation6], 1 }
 0x194   :  { %124 = vsyncpa [#allocation4], 1 }

</bundles_post_ra>
